<compile_context>
chip_gen: v5e
topology: v5e:2x2
jax: 0.10.0
libtpu: 0.0.40
codegen_flags: <defaults>
</compile_context>

<pallas_src>
from typing import NamedTuple

import jax
import jax.numpy as jnp
from jax import lax
from jax.experimental import pallas as pl
from jax.experimental.pallas import tpu as pltpu


def _round_up(x, m):
    return (x + m - 1) // m * m


# ----------------------------- kernel --------------------------------------


def laplace_loss_kernel(L_ref, vT_ref, wc_ref, out_ref, acc_ref):
    """Grid = (row tiles i [parallel], reduction tiles k [arbitrary])."""
    k = pl.program_id(1)

    # Zero the (tv, 8) accumulator at the start of each row tile.
    @pl.when(k == 0)
    def _():
        acc_ref[...] = jnp.zeros_like(acc_ref)

    # acc[i-tile] += L[i-tile, k-tile] @ verts[k-tile, :]
    # L is stored f32 / bf16 / int8; the cast up runs on the VPU and is hidden
    # under the L DMA (kernel is HBM-bound on L).  The contraction is f32, so
    # only L's storage dtype contributes quantization error.
    lhs = L_ref[...].astype(jnp.float32)             # (tv, tk)
    rhs = vT_ref[...]                                # (8, tk)  f32, lane-dense
    acc_ref[...] += lax.dot_general(
        lhs, rhs,
        dimension_numbers=(((1,), (1,)), ((), ())),  # contract tk with tk
        preferred_element_type=jnp.float32,
    )                                                # (tv, 8); cols 3..7 stay 0

    # Last reduction step: row norms, weighting, per-row-tile partial sum.
    @pl.when(k == pl.num_programs(1) - 1)
    def _():
        y = acc_ref[...]                                        # (tv, 8) f32
        nrm = jnp.sqrt(jnp.sum(y * y, axis=1, keepdims=True))   # (tv, 1)
        partial = jnp.sum(nrm * wc_ref[...])                    # scalar
        # Lane-dense (1, 8, 128) broadcast store -> full unmasked vst, and no
        # cross-i dependency, so the i axis can be megacore-parallel.
        out_ref[...] = jnp.full(out_ref.shape, partial, jnp.float32)


# -------------------- one-time Laplacian preparation ------------------------


class PreparedLaplacian(NamedTuple):
    L: jax.Array          # (vr_pad, vc_pad), storage dtype (f32 / bf16 / int8)
    wc: jax.Array         # (vr_pad, 1) f32: weights * coefs [* int8 row scale]
    num_verts: int
    vr_pad: int
    vc_pad: int
    tv: int
    tk: int


def prepare_laplacian(L, weights, coefs=None, *, tv=512, tk=2048,
                      l_dtype=jnp.bfloat16):
    """One-time (per mesh topology) preprocessing of the packed Laplacian.

    Mirrors the module's `precomputed_laplacian` cache: the O(V^2) pad + cast
    (and optional int8 quantization) happens here, NOT in the per-step loss.
    """
    V = L.shape[0]
    assert L.shape == (V, V)

    weights = weights.reshape(V).astype(jnp.float32)
    wc = weights if coefs is None else weights * coefs.reshape(V).astype(jnp.float32)

    # --- tile selection: tv a multiple of 32 (covers f32/bf16/int8 sublane
    # packing), tk a multiple of 128; both clamped to the data size. ---------
    tv = max(32, _round_up(int(tv), 32))
    tk = max(128, _round_up(int(tk), 128))
    tv = min(tv, _round_up(V, 32))
    tk = min(tk, _round_up(V, 128))
    # v7x megacore: guarantee >= 2 row tiles on the parallel axis when V allows
    # it (grow tk, not tv, when enlarging tiles).
    if _round_up(V, tv) // tv < 2 and _round_up(V, 32) >= 64:
        tv = _round_up((_round_up(V, 32) + 1) // 2, 32)
    # Independent row / column padding (no lcm blow-up).
    vr_pad = _round_up(V, tv)
    vc_pad = _round_up(V, tk)

    Lf = L.astype(jnp.float32)
    if l_dtype == jnp.int8:
        # Per-row symmetric quantization; the scale folds into wc exactly:
        #   || s_i * (q_i @ verts) || * w_i  ==  || q_i @ verts || * (w_i * s_i)
        row_amax = jnp.max(jnp.abs(Lf), axis=1, keepdims=True)
        scale = jnp.where(row_amax > 0, row_amax / 127.0, 1.0)         # (V, 1)
        Ls = jnp.clip(jnp.round(Lf / scale), -127.0, 127.0).astype(jnp.int8)
        wc = wc * scale[:, 0]
    else:
        Ls = Lf.astype(l_dtype)

    # Padded rows/cols are zero: y = 0 -> ||y|| = 0 and wc = 0 there, so the
    # padding contributes exactly 0 to the loss.
    Lp = jnp.zeros((vr_pad, vc_pad), Ls.dtype).at[:V, :V].set(Ls)
    wcp = jnp.zeros((vr_pad, 1), jnp.float32).at[:V, 0].set(wc)
    return PreparedLaplacian(Lp, wcp, V, vr_pad, vc_pad, tv, tk)


# ----------------------------- per-call loss --------------------------------


def laplace_mesh_loss(prep: PreparedLaplacian, verts, num_meshes):
    """Pallas forward of LaplaceMeshLoss(type='uniform')."""
    V, D = verts.shape
    assert V == prep.num_verts and D <= 8
    if V == 0:                                   # meshes.isempty()
        return jnp.zeros((), jnp.float32)

    # Per-call work is O(V): transpose + pad verts into a lane-dense (8, Vc)
    # f32 slab (padded sublanes / lanes are zero and contribute nothing).
    vT = jnp.zeros((8, prep.vc_pad), jnp.float32).at[:D, :V].set(
        verts.astype(jnp.float32).T)

    tv, tk = prep.tv, prep.tk
    n_row = prep.vr_pad // tv
    n_col = prep.vc_pad // tk

    partials = pl.pallas_call(
        laplace_loss_kernel,
        out_shape=jax.ShapeDtypeStruct((n_row, 8, 128), jnp.float32),
        grid_spec=pltpu.PrefetchScalarGridSpec(
            num_scalar_prefetch=0,
            grid=(n_row, n_col),                 # (i row tiles, k red. tiles)
            in_specs=[
                # L tile: the dominant HBM stream (f32/bf16/int8 storage).
                # (pipeline_mode=pl.Buffered(3) is a possible single-digit-%
                #  win; left at the default depth of 2.)
                pl.BlockSpec((tv, tk), lambda i, k: (i, k)),
                # Transposed verts: lane-dense (8, tk) f32 (~16 KiB @ tk=2048).
                pl.BlockSpec((8, tk), lambda i, k: (0, k)),
                # weights * coefs (* int8 row scale).
                pl.BlockSpec((tv, 1), lambda i, k: (i, 0)),
            ],
            out_specs=pl.BlockSpec((1, 8, 128), lambda i, k: (i, 0, 0)),
            scratch_shapes=[pltpu.VMEM((tv, 8), jnp.float32)],
        ),
        compiler_params=pltpu.CompilerParams(
            # i (row tiles) is independent -> megacore-parallel on v7x;
            # k is the reduction axis.  VMEM @ bf16 defaults (tv<=512,tk=2048):
            # ~4 MiB (L dbl-buf) + small -> << 16 MiB scoped on v5e.
            dimension_semantics=("parallel", "arbitrary"),
        ),
    )(prep.L, vT, prep.wc)

    # Tiny final reduction over per-row-tile partials in plain JAX.
    return jnp.sum(partials[:, 0, 0]) / jnp.float32(num_meshes)


# ----------------------------- test harness ---------------------------------


def build_uniform_laplacian_ring(num_meshes, verts_per_mesh):
    """Synthetic packed uniform Laplacian: each mesh is a closed ring.
    L[i, j] = 1/deg(i) for neighbors j, L[i, i] = -1 (pytorch3d convention)."""
    V = num_meshes * verts_per_mesh
    L = jnp.zeros((V, V), jnp.float32)
    idx = jnp.arange(verts_per_mesh)
    for m in range(num_meshes):
        off = m * verts_per_mesh
        nxt = off + (idx + 1) % verts_per_mesh
        prv = off + (idx - 1) % verts_per_mesh
        cur = off + idx
        deg = 2.0
        L = L.at[cur, nxt].set(1.0 / deg)
        L = L.at[cur, prv].set(1.0 / deg)
        L = L.at[cur, cur].set(-1.0)
    return L


def reference_loss(L, verts, weights, coefs, num_meshes):
    y = L @ verts
    nrm = jnp.sqrt(jnp.sum(y * y, axis=1))
    loss = nrm * weights.reshape(-1)
    if coefs is not None:
        loss = loss * coefs.reshape(-1)
    return jnp.sum(loss) / num_meshes


if __name__ == "__main__":
    key = jax.random.PRNGKey(0)
    k_v, k_c = jax.random.split(key)

    num_meshes = 2                    # N
    verts_per_mesh = 200
    V = num_meshes * verts_per_mesh   # 400 packed vertices (ragged vs 128)
    D = 3

    verts_packed = jax.random.normal(k_v, (V, D), jnp.float32)
    coefs = jax.random.uniform(k_c, (V, 1), jnp.float32, 0.5, 1.5)

    # weights = 1 / num_verts_per_mesh gathered per packed vertex
    num_verts_per_mesh = jnp.full((num_meshes,), verts_per_mesh, jnp.float32)
    verts_to_mesh_idx = jnp.repeat(jnp.arange(num_meshes), verts_per_mesh)
    weights = 1.0 / num_verts_per_mesh[verts_to_mesh_idx]

    L = build_uniform_laplacian_ring(num_meshes, verts_per_mesh)
    ref = reference_loss(L, verts_packed, weights, coefs, num_meshes)

    # 1) f32 L storage with small tiles -> multi-step (7 x 4) grid exercising
    #    padding, accumulator init/finalize and the parallel row axis.
    prep_f32 = prepare_laplacian(L, weights, coefs, tv=64, tk=128,
                                 l_dtype=jnp.float32)
    out_f32 = jax.block_until_ready(
        laplace_mesh_loss(prep_f32, verts_packed, num_meshes))
    assert jnp.allclose(out_f32, ref, rtol=1e-4, atol=1e-5), (out_f32, ref)

    # 2) Optimized default path: bf16 L storage, big tiles, f32 accumulation,
    #    >= 2 row tiles for megacore.
    prep_bf16 = prepare_laplacian(L, weights, coefs)
    out_bf16 = jax.block_until_ready(
        laplace_mesh_loss(prep_bf16, verts_packed, num_meshes))
    assert jnp.allclose(out_bf16, ref, rtol=1e-2, atol=1e-3), (out_bf16, ref)

    # 3) int8 L storage with exact per-row scales folded into the weight
    #    stream (halves the dominant HBM stream; for v5e/v6e int MXU paths
    #    the cast-up still keeps the contraction exact in f32).
    prep_i8 = prepare_laplacian(L, weights, coefs, l_dtype=jnp.int8)
    out_i8 = jax.block_until_ready(
        laplace_mesh_loss(prep_i8, verts_packed, num_meshes))
    assert jnp.allclose(out_i8, ref, rtol=3e-2, atol=1e-3), (out_i8, ref)

    print("KERNEL_OK")
</pallas_src>

<mosaic_0001>
module attributes {stable_mosaic.version = 11 : i64} {
  func.func @laplace_loss_kernel(%arg0: i32, %arg1: i32, %arg2: memref<64x128xf32, #tpu.memory_space<vmem>>, %arg3: memref<8x128xf32, #tpu.memory_space<vmem>>, %arg4: memref<64x1xf32, #tpu.memory_space<vmem>>, %arg5: memref<1x8x128xf32, #tpu.memory_space<vmem>>, %arg6: memref<64x8xf32, #tpu.memory_space<vmem>>) attributes {dimension_semantics = [#tpu.dimension_semantics<parallel>, #tpu.dimension_semantics<arbitrary>], iteration_bounds = array<i64: 7, 4>, scalar_prefetch = 0 : i64, scratch_operands = 1 : i64, tpu.core_type = #tpu.core_type<tc>, window_params = [{transform_indices = @transform_0, window_bounds = array<i64: 64, 128>}, {transform_indices = @transform_1, window_bounds = array<i64: 8, 128>}, {transform_indices = @transform_2, window_bounds = array<i64: 64, 1>}, {transform_indices = @transform_3, window_bounds = array<i64: 1, 8, 128>}]} {
    %c0_i32 = arith.constant 0 : i32
    %0 = arith.cmpi eq, %arg1, %c0_i32 : i32
    %1 = arith.extui %0 : i1 to i32
    %c0_i32_0 = arith.constant 0 : i32
    %2 = arith.cmpi ne, %1, %c0_i32_0 : i32
    scf.if %2 {
      %cst_9 = arith.constant 0.000000e+00 : f32
      %12 = vector.broadcast %cst_9 : f32 to vector<64x8xf32>
      %c0_10 = arith.constant 0 : index
      %c0_11 = arith.constant 0 : index
      %13 = vector.load %arg6[%c0_10, %c0_11] : memref<64x8xf32, #tpu.memory_space<vmem>>, vector<64x8xf32>
      tpu.vector_store %arg6[%c0_10, %c0_11], %12 {strides = array<i32>} : memref<64x8xf32, #tpu.memory_space<vmem>>, vector<64x8xf32>,
    } else {
    }
    %c0 = arith.constant 0 : index
    %c0_1 = arith.constant 0 : index
    %3 = vector.load %arg2[%c0, %c0_1] : memref<64x128xf32, #tpu.memory_space<vmem>>, vector<64x128xf32>
    %c0_2 = arith.constant 0 : index
    %c0_3 = arith.constant 0 : index
    %4 = vector.load %arg3[%c0_2, %c0_3] : memref<8x128xf32, #tpu.memory_space<vmem>>, vector<8x128xf32>
    %c0_4 = arith.constant 0 : index
    %c0_5 = arith.constant 0 : index
    %5 = vector.load %arg6[%c0_4, %c0_5] : memref<64x8xf32, #tpu.memory_space<vmem>>, vector<64x8xf32>
    %cst = arith.constant dense<0.000000e+00> : vector<64x8xf32>
    %6 = tpu.matmul %3, %4, %cst {dimension_numbers = #tpu.dot_dimension_numbers<[1], [1], [0], [0], [0, 0, 1, 0], [], []>} : vector<64x128xf32>, vector<8x128xf32>, vector<64x8xf32> -> vector<64x8xf32>
    %7 = arith.addf %5, %6 : vector<64x8xf32>
    %c0_6 = arith.constant 0 : index
    %c0_7 = arith.constant 0 : index
    %8 = vector.load %arg6[%c0_6, %c0_7] : memref<64x8xf32, #tpu.memory_space<vmem>>, vector<64x8xf32>
    tpu.vector_store %arg6[%c0_6, %c0_7], %7 {strides = array<i32>} : memref<64x8xf32, #tpu.memory_space<vmem>>, vector<64x8xf32>,
    %c3_i32 = arith.constant 3 : i32
    %9 = arith.cmpi eq, %arg1, %c3_i32 : i32
    %10 = arith.extui %9 : i1 to i32
    %c0_i32_8 = arith.constant 0 : i32
    %11 = arith.cmpi ne, %10, %c0_i32_8 : i32
    scf.if %11 {
      %c0_9 = arith.constant 0 : index
      %c0_10 = arith.constant 0 : index
      %12 = vector.load %arg6[%c0_9, %c0_10] : memref<64x8xf32, #tpu.memory_space<vmem>>, vector<64x8xf32>
      %13 = arith.mulf %12, %12 : vector<64x8xf32>
      %cst_11 = arith.constant dense<0.000000e+00> : vector<64xf32>
      %14 = vector.multi_reduction <add>, %13, %cst_11 [1] : vector<64x8xf32> to vector<64xf32>
      %15 = vector.shape_cast %14 : vector<64xf32> to vector<64x1xf32>
      %16 = math.sqrt %15 : vector<64x1xf32>
      %c0_12 = arith.constant 0 : index
      %c0_13 = arith.constant 0 : index
      %17 = vector.load %arg4[%c0_12, %c0_13] : memref<64x1xf32, #tpu.memory_space<vmem>>, vector<64x1xf32>
      %18 = arith.mulf %16, %17 : vector<64x1xf32>
      %19 = vector.shape_cast %18 : vector<64x1xf32> to vector<1x64x1xf32>
      %cst_14 = arith.constant dense<0.000000e+00> : vector<1xf32>
      %20 = vector.multi_reduction <add>, %19, %cst_14 [1, 2] : vector<1x64x1xf32> to vector<1xf32>
      %21 = vector.shape_cast %20 : vector<1xf32> to vector<1x1x1xf32>
      %22 = vector.extract %21[0, 0, 0] : f32 from vector<1x1x1xf32>
      %23 = vector.broadcast %22 : f32 to vector<1x8x128xf32>
      %c0_15 = arith.constant 0 : index
      %c0_16 = arith.constant 0 : index
      %c0_17 = arith.constant 0 : index
      %24 = vector.load %arg5[%c0_15, %c0_16, %c0_17] : memref<1x8x128xf32, #tpu.memory_space<vmem>>, vector<1x8x128xf32>
      tpu.vector_store %arg5[%c0_15, %c0_16, %c0_17], %23 {strides = array<i32>} : memref<1x8x128xf32, #tpu.memory_space<vmem>>, vector<1x8x128xf32>,
    } else {
    }
    return
  }
  func.func @transform_0(%arg0: i32, %arg1: i32) -> (i32, i32) {
    %c0_i32 = arith.constant 0 : i32
    return %arg0, %arg1 : i32, i32
  }
  func.func @transform_1(%arg0: i32, %arg1: i32) -> (i32, i32) {
    %c0_i32 = arith.constant 0 : i32
    %c0_i32_0 = arith.constant 0 : i32
    return %c0_i32, %arg1 : i32, i32
  }
  func.func @transform_2(%arg0: i32, %arg1: i32) -> (i32, i32) {
    %c0_i32 = arith.constant 0 : i32
    %c0_i32_0 = arith.constant 0 : i32
    return %arg0, %c0_i32 : i32, i32
  }
  func.func @transform_3(%arg0: i32, %arg1: i32) -> (i32, i32, i32) {
    %c0_i32 = arith.constant 0 : i32
    %c0_i32_0 = arith.constant 0 : i32
    %c0_i32_1 = arith.constant 0 : i32
    return %arg0, %c0_i32, %c0_i32_0 : i32, i32, i32
  }
}

</mosaic_0001>

<bundles_post_ra>
// kernel: tpu_custom_call.1
= control target key start
LH: loop header
LB: loop body
LE: loop exit
PB: predicated region body
PF: predicated region fallthrough
CT: control target
= control target key end

     0   :  { %8 = vsyncpa [#allocation4], 0  ;;  %s1289_s0 = inlined_call_operand.hbm [shape: f32[448,512], index: 0, kind: input, shape index: {}]   ;;  %s1290_s1 = inlined_call_operand.vmem [shape: f32[8,512], index: 1, kind: input, shape index: {}]   ;;  %s1291_s2 = inlined_call_operand.vmem [shape: f32[448,1], index: 2, kind: input, shape index: {}]   ;;  %s1292_s3 = inlined_call_operand.hbm [shape: f32[7,8,128], index: 3, kind: output, shape index: {}]  }
   0x1   :  { %10 = vsyncpa [#allocation4 + $0x1], 0 }
   0x2   :  { %11 = vsyncpa [#allocation5], 0 }
   0x3   :  { %13 = vsyncpa [#allocation5 + $0x1], 0  ;;  %s967_s12 = smov 0   ;;  %s969_s13 = smov 0  }
   0x4   :  { %s971_s14 = smov 0   ;;  %s973_s15 = smov 0  }
   0x5   :  { %s975_s16 = smov 0   ;;  %s977_s17 = smov 0  }
   0x6   :  { %s979_s18 = smov 0   ;;  %s981_s19 = smov 0  }
   0x7   :  { %s983_s20 = smov 0   ;;  %s985_s21 = smov 0  }
   0x8   :  { %s987_s22 = smov 0  }
   0x9 LB: > { %1297 = sst [smem:[#allocation9_spill]] %s909_s14  ;;  %s641_s23 = sadd.s32 4294967295, %s941_s22   ;;  %s941_s22 = sphi %s987_s22, %s19_s22   ;;  %s937_s21 = sphi %s985_s21, %s1320_s21   ;;  %s933_s20 = sphi %s983_s20, %s1319_s20   ;;  %s929_s19 = sphi %s981_s19, %s1318_s19   ;;  %s925_s18 = sphi %s979_s18, %s1317_s18   ;;  %s921_s17 = sphi %s977_s17, %s1310_s17   ;;  %s917_s16 = sphi %s975_s16, %s1316_s16   ;;  %s913_s15 = sphi %s973_s15, %s1315_s15   ;;  %s909_s14 = sphi %s971_s14, %s1308_s14   ;;  %s905_s13 = sphi %s969_s13, %s1314_s13   ;;  %s901_s12 = sphi %s967_s12, %s1313_s12  }
   0xa   : > { %1298 = sst [smem:[#allocation10_spill]] %s921_s17  ;;  %s642_s24 = sadd.s32 4294967294, %s941_s22  }
   0xb   : > { %s28_s25 = sadd.s32 1, %s933_s20  ;;  %s31_s26 = sadd.s32 1, %s937_s21 }
   0xc   : > { %p29_p0 = scmp.ge.s32.totalorder %s28_s25, 4  ;;  %s40_s27 = sadd.s32 1, %s921_s17 }
   0xd   : > { %p47_p1 = scmp.ne.s32.totalorder %s921_s17, %s917_s16  ;;  %p48_p2 = scmp.eq.s32.totalorder %s941_s22, 0 }
   0xe   : > { %s1322_s25 = smov (%p29_p0, %s28_s25), 0  ;;  %s1324_s26 = smov (!%p29_p0, %s31_s26), %s937_s21 }
   0xf   : > { %1299 = sst [smem:[#allocation11_spill]] %s1322_s25  ;;  %s36_s28 = ssub.s32 %s933_s20, %s1322_s25 }
  0x10   : > { %p1033_p3 = por %p48_p2, %p47_p1  ;;  %p33_p4 = scmp.ge.s32.totalorder %s1324_s26, 7 }
  0x11   : > { %p53_p5 = scmp.ne.s32.totalorder %s917_s16, %s913_s15  ;;  %p54_p6 = scmp.eq.s32.totalorder %s641_s23, 0 }
  0x12   : > { %s118_s30 = sadd.s32 1, %s909_s14  ;;  %s1326_s26 = smov (%p33_p4, %s1324_s26), 0 }
  0x13   : > { %1301 = sst [smem:[#allocation12_spill]] %s1326_s26  ;;  %p1041_p7 = por %p54_p6, %p53_p5 }
  0x14   : > { %p128_p8 = scmp.ne.s32.totalorder %s909_s14, %s905_s13  ;;  %s35_s5 = ssub.s32 %s937_s21, %s1326_s26 }
  0x15   : > { %p129_p9 = scmp.eq.s32.totalorder %s641_s23, 27  ;;  %s37_s6 = sor.u32 %s36_s28, %s35_s5 }
  0x16   : > { %p116_p10 = scmp.eq.s32.totalorder %s35_s5, 0  ;;  %p38_p11 = scmp.eq.s32.totalorder %s37_s6, 0 }
  0x17   : > { %p1049_p12 = por %p129_p9, %p128_p8  ;;  %p134_p13 = scmp.ne.s32.totalorder %s905_s13, %s901_s12 }
  0x18   : > { %s1054_s8 = scalar_select %p116_p10, %s909_s14, %s118_s30  }
  0x19   : > { %s1057_s9 = scalar_select %p38_p11, %s921_s17, %s40_s27  }
  0x1a   : > { %1304 = sst [smem:[#allocation13_spill]] %s1054_s8  ;;  %p135_p0 = scmp.eq.s32.totalorder %s642_s24, 27 }
  0x1b   : > { %1305 = sst [smem:[#allocation14_spill]] %s1057_s9  ;;  %p679_p1 = scmp.lt.s32.totalorder %s941_s22, 28 }
  0x1c   : > { %p1062_p2 = por %p135_p0, %p134_p13  ;;  %s155_s11 = sand.u32 1, %s921_s17  }
  0x1d   : > { %s645_s15 = sshll.u32 %s155_s11, 6  ;;  %s661_s23 = sshll.u32 %s937_s21, 5 }
  0x1e   : > { %s164_s28 = sadd.s32 %s933_s20, %s661_s23  ;;  %s159_s5 = scalar_lea.vmem [#allocation3], %s645_s15 }
  0x1f   : > { %s169_s6 = sshll.u32 %s159_s5, 4  ;;  %s648_s26 = sshll.u32 %s164_s28, 3  ;;  %s170_s6 = int_to_ptr.vmem [resolvable:$true] %s169_s6 }
  0x20   : > { %s166_s25 = scalar_lea.hbm %s1289_s0, %s648_s26  ;;  %p672_p4 = pnand %p679_p1, %p1033_p3 }
  0x21   : > { %s167_s24 = sshll.u32 %s166_s25, 4  ;;  %s156_s9 = scalar_lea.sflag [#allocation4], %s155_s11  ;;  %s168_s24 = int_to_ptr.hbm [resolvable:$true] %s167_s24 }
  0x22   : > { %s943_s8 = smov 512   ;;  %s944_s17 = smov 128  }
  0x23   : > { %s945_s14 = smov 8   ;;  %p649_p5 = scmp.ge.s32.totalorder %s941_s22, 1 }
  0x24   : > { %674 = dma.hbm_to_vmem [thread:$0]  (!%p672_p4), %s168_s24, 1024, %s170_s6, %s156_s9, %s943_s8, %s944_s17, %s945_s14  }
  0x25   : > { %p193_p6 = scmp.lt.s32.totalorder %s941_s22, 29 }
  0x27   : > { %p194_p8 = pnand %p649_p5, %p193_p6 }
  0x28   : > { %s199_s15 = sand.u32 (!%p194_p8), 1, %s917_s16  }
  0x29   : > { %197 = sbr.rel (%p194_p8) target bundleno = 578 (0x242), region = 32  ;;  %s650_s23 = sshll.u32 (!%p194_p8), %s199_s15, 6 }
  0x2a   : > { %s200_s28 = scalar_lea.sflag (!%p194_p8), [#allocation4], %s199_s15  ;;  %s1077_s5 = scalar_lea.vmem (!%p194_p8), [#allocation3], %s650_s23 }
  0x2e   : > { %892 = dma.done.wait (%p1041_p7), %s200_s28, 1024  }
  0x2f   : > { %894 = vsyncadd (%p1041_p7), %s200_s28, 4294966272  ;;  %s233_s14 = sand.u32 1, %s905_s13   ;;  %p237_p3 = scmp.lt.s32.totalorder %s925_s18, 3 }
  0x30   : > { %s1087_s17 = sshll.u32 %s233_s14, 3  ;;  %s1090_s25 = sshll.u32 %s929_s19, 3 }
  0x31   : > { %p242_p9 = scmp.lt.s32.totalorder %s1090_s25, 55  ;;  %s235_s15 = scalar_lea.vmem [#allocation6], %s1087_s17 }
  0x32   : > { %s238_s26 = scalar_select %p237_p3, %s925_s18, 3 }
  0x33   : > { %s243_s29 = scalar_select %p242_p9, %s1090_s25, 55 }
  0x34   : > { %s652_s4 = sshll.u32 %s238_s26, 3  ;;  %p655_p7 = scmp.ne.s32.totalorder %s925_s18, 0 }
  0x35   : > { %s240_s11 = scalar_lea.vmem %s1290_s1, %s652_s4  ;;  %s654_s6 = sshll.u32 %s243_s29, 3 }
  0x36   : > { %s1101_s24 = scalar_lea.vmem %s1291_s2, %s654_s6  ;;  %250 = sbr.rel (%p655_p7) target bundleno = 68 (0x44), region = 40 }
  0x3b   : > { %vm251_vm0 = vcmask 64512   ;;  %v946_v0 = vmov 0.0  }
  0x3c   : > { %252 = vst.msk [vmem:[#allocation2] sm:$0xff] %vm251_vm0, %v946_v0 }
  0x3d   : > { %253 = vst.msk [vmem:[#allocation2 + $0x8] sm:$0xff] %vm251_vm0, %v946_v0 }
  0x3e   : > { %254 = vst.msk [vmem:[#allocation2 + $0x10] sm:$0xff] %vm251_vm0, %v946_v0 }
  0x3f   : > { %255 = vst.msk [vmem:[#allocation2 + $0x18] sm:$0xff] %vm251_vm0, %v946_v0 }
  0x40   : > { %256 = vst.msk [vmem:[#allocation2 + $0x20] sm:$0xff] %vm251_vm0, %v946_v0 }
  0x41   : > { %257 = vst.msk [vmem:[#allocation2 + $0x28] sm:$0xff] %vm251_vm0, %v946_v0 }
  0x42   : > { %258 = vst.msk [vmem:[#allocation2 + $0x30] sm:$0xff] %vm251_vm0, %v946_v0 }
  0x43   : > { %259 = vst.msk [vmem:[#allocation2 + $0x38] sm:$0xff] %vm251_vm0, %v946_v0 }
  0x44 PF: > { %v268_v1 = vld [vmem:[%s240_s11] sm:$0xff]  ;;  %v266_v3 = vld [vmem:[%s1077_s5 + $0x30] sm:$0xff]  ;;  %v265_v6 = vld [vmem:[%s1077_s5 + $0x28] sm:$0xff]  ;;  %vm326_vm1 = vcmask 64512   ;;  %p656_p10 = scmp.ne.s32.totalorder %s925_s18, 3 }
  0x45   : > { %663 = vmatpush.xpose.msra.mxu2 %v268_v1  ;;  %664 = vmatpush.xpose.msra.mxu3 %v268_v1  ;;  %v264_v2 = vld [vmem:[%s1077_s5 + $0x20] sm:$0xff]  ;;  %v262_v5 = vld [vmem:[%s1077_s5 + $0x10] sm:$0xff]  ;;  %v267_v7 = vld [vmem:[%s1077_s5 + $0x38] sm:$0xff] }
  0x46   : > { %292 = vmatpush.xpose.msra.mxu0 %v268_v1  ;;  %662 = vmatpush.xpose.msra.mxu1 %v268_v1  ;;  %v260_v4 = vld [vmem:[%s1077_s5] sm:$0xff]  ;;  %v261_v8 = vld [vmem:[%s1077_s5 + $0x8] sm:$0xff]  ;;  %v263_v9 = vld [vmem:[%s1077_s5 + $0x18] sm:$0xff] }
  0x47   : > { %v269_v10 = vld [vmem:[#allocation2] sm:$0xff]  ;;  %v271_v11 = vld [vmem:[#allocation2 + $0x10] sm:$0xff]  ;;  %v270_v22 = vld [vmem:[#allocation2 + $0x8] sm:$0xff] }
  0x48   : > { %305 = vmatmul.f32.vlgmr.msra.gmra.mxu2 %v264_v2  ;;  %311 = vmatmul.f32.vlgmr.msra.gmra.mxu3 %v266_v3  ;;  %v273_v16 = vld [vmem:[#allocation2 + $0x20] sm:$0xff]  ;;  %v272_v23 = vld [vmem:[#allocation2 + $0x18] sm:$0xff]  ;;  %v274_v28 = vld [vmem:[#allocation2 + $0x28] sm:$0xff] }
  0x49   : > { %293 = vmatmul.f32.vlgmr.msra.gmra.mxu0 %v260_v4  ;;  %299 = vmatmul.f32.vlgmr.msra.gmra.mxu1 %v262_v5  ;;  %v275_v17 = vld [vmem:[#allocation2 + $0x30] sm:$0xff] }
  0x4a   : > { %v276_v29 = vld [vmem:[#allocation2 + $0x38] sm:$0xff] }
  0x50   : > { %308 = vmatmul.f32.gmra.mxu2 %v265_v6  ;;  %314 = vmatmul.f32.gmra.mxu3 %v267_v7 }
  0x51   : > { %296 = vmatmul.f32.gmra.mxu0 %v261_v8  ;;  %302 = vmatmul.f32.gmra.mxu1 %v263_v9 }
  0xc6   : > { %v294_v12 = vpop.f32.mrf.mxu0  ;;  %v300_v13 = vpop.f32.mrf.mxu1 }
  0xc7   : > { %v318_v14 = vadd.f32 %v294_v12, %v269_v10  ;;  %v320_v15 = vadd.f32 %v300_v13, %v271_v11 }
  0xc9   : > { %327 = vst.msk [vmem:[#allocation2] sm:$0xff] %vm326_vm1, %v318_v14 }
  0xca   : > { %329 = vst.msk [vmem:[#allocation2 + $0x10] sm:$0xff] %vm326_vm1, %v320_v15 }
  0xcb   : > { %v306_v18 = vpop.f32.mrf.mxu2  ;;  %v312_v19 = vpop.f32.mrf.mxu3 }
  0xcc   : > { %v322_v20 = vadd.f32 %v306_v18, %v273_v16  ;;  %v324_v21 = vadd.f32 %v312_v19, %v275_v17 }
  0xce   : > { %331 = vst.msk [vmem:[#allocation2 + $0x20] sm:$0xff] %vm326_vm1, %v322_v20  ;;  %v297_v24 = vpop.f32.mrf.mxu0  ;;  %v303_v25 = vpop.f32.mrf.mxu1 }
  0xcf   : > { %333 = vst.msk [vmem:[#allocation2 + $0x30] sm:$0xff] %vm326_vm1, %v324_v21  ;;  %v319_v26 = vadd.f32 %v297_v24, %v270_v22  ;;  %v321_v27 = vadd.f32 %v303_v25, %v272_v23 }
  0xd1   : > { %328 = vst.msk [vmem:[#allocation2 + $0x8] sm:$0xff] %vm326_vm1, %v319_v26 }
  0xd2   : > { %330 = vst.msk [vmem:[#allocation2 + $0x18] sm:$0xff] %vm326_vm1, %v321_v27 }
  0xd3   : > { %v309_v30 = vpop.f32.mrf.mxu2  ;;  %v315_v31 = vpop.f32.mrf.mxu3  ;;  %338 = sbr.rel (%p656_p10) target bundleno = 564 (0x234), region = 44 }
  0xd4   : > { %v323_v32 = vadd.f32 %v309_v30, %v274_v28  ;;  %v325_v33 = vadd.f32 %v315_v31, %v276_v29 }
  0xd6   : > { %332 = vst.msk [vmem:[#allocation2 + $0x28] sm:$0xff] %vm326_vm1, %v323_v32 }
  0xd7   : > { %334 = vst.msk [vmem:[#allocation2 + $0x38] sm:$0xff] %vm326_vm1, %v325_v33 }
  0xd8   : > { %v343_v34 = vld [vmem:[#allocation2 + $0x20] sm:$0xff]  ;;  %v341_v35 = vld [vmem:[#allocation2 + $0x10] sm:$0xff]  ;;  %v340_v45 = vld [vmem:[#allocation2 + $0x8] sm:$0xff]  ;;  %vm491_vm6 = vcmask 7168  }
  0xd9   : > { %v339_v36 = vld [vmem:[#allocation2] sm:$0xff]  ;;  %v351_v37 = vmul.f32 %v343_v34, %v343_v34  ;;  %v349_v38 = vmul.f32 %v341_v35, %v341_v35  ;;  %v342_v41 = vld [vmem:[#allocation2 + $0x18] sm:$0xff]  ;;  %v348_v48 = vmul.f32 %v340_v45, %v340_v45  ;;  %v345_v53 = vld [vmem:[#allocation2 + $0x30] sm:$0xff] }
  0xda   : > { %v347_v39 = vmul.f32 %v339_v36, %v339_v36  ;;  %v350_v47 = vmul.f32 %v342_v41, %v342_v41  ;;  %v353_v55 = vmul.f32 %v345_v53, %v345_v53 }
  0xdb   : > { %v367_v42 = vsel %vm326_vm1, %v351_v37, 0.0  ;;  %v361_v43 = vsel %vm326_vm1, %v349_v38, 0.0  ;;  %v358_v51 = vsel %vm326_vm1, %v348_v48, 0.0 }
  0xdc   : > { %v355_v44 = vsel %vm326_vm1, %v347_v39, 0.0  ;;  %368 = vadd.xlane.f32.xlu2 %v367_v42  ;;  %362 = vadd.xlane.f32.xlu1 %v361_v43  ;;  %v364_v50 = vsel %vm326_vm1, %v350_v47, 0.0  ;;  %v373_v57 = vsel %vm326_vm1, %v353_v55, 0.0 }
  0xdd   : > { %v344_v40 = vld [vmem:[#allocation2 + $0x28] sm:$0xff]  ;;  %356 = vadd.xlane.f32.xlu0 %v355_v44 }
  0xde   : > { %v352_v46 = vmul.f32 %v344_v40, %v344_v40  ;;  %v346_v52 = vld [vmem:[#allocation2 + $0x38] sm:$0xff] }
  0xdf   : > { %v354_v54 = vmul.f32 %v346_v52, %v346_v52  ;;  %v475_v52 = vld [vmem:[%s1101_s24] sm:$0xff] }
  0xe0   : > { %v370_v49 = vsel %vm326_vm1, %v352_v46, 0.0 }
  0xe1   : > { %v376_v56 = vsel %vm326_vm1, %v354_v54, 0.0 }
  0xe4   : > { %371 = vadd.xlane.f32.xlu2 %v370_v49  ;;  %365 = vadd.xlane.f32.xlu1 %v364_v50 }
  0xe5   : > { %359 = vadd.xlane.f32.xlu0 %v358_v51 }
  0xec   : > { %377 = vadd.xlane.f32.xlu1 %v376_v56 }
  0xed   : > { %374 = vadd.xlane.f32.xlu0 %v373_v57 }
 0x14f   : > { %v1130_v58 = vpop.xlane.xlu2 %368  ;;  %v1132_v59 = vpop.xlane.xlu1 %362 }
 0x150   : > { %773 = vrsqrt.f32 %v1130_v58  ;;  %v1135_v60 = vpop.xlane.xlu0 %356  ;;  %v437_v26 = vand.u32 2147483648, %v1130_v58  ;;  %vm434_vm2 = vcmp.eq.f32.partialorder %v1130_v58, inf  ;;  %vm410_vm3 = vcmp.eq.f32.partialorder %v1132_v59, inf }
 0x151   : > { %775 = vrsqrt.f32 %v1132_v59  ;;  %vm412_vm4 = vcmp.eq.f32.partialorder %v1132_v59, 0.0  ;;  %v413_v34 = vand.u32 2147483648, %v1132_v59  ;;  %vm386_vm5 = vcmp.eq.f32.partialorder %v1135_v60, inf }
 0x152   : > { %777 = vrsqrt.f32 %v1135_v60  ;;  %vm388_vm7 = vcmp.eq.f32.partialorder %v1135_v60, 0.0  ;;  %v389_v39 = vand.u32 2147483648, %v1135_v60  ;;  %vm436_vm8 = vcmp.eq.f32.partialorder %v1130_v58, 0.0 }
 0x156   : > { %v774_v61 = vpop.eup %773 }
 0x157   : > { %v776_v62 = vpop.eup %775  ;;  %v428_v63 = vmul.f32 %v774_v61, %v1130_v58  ;;  %v1140_v0 = vpop.xlane.xlu2 %371 }
 0x158   : > { %v1142_v1 = vpop.xlane.xlu1 %365  ;;  %v778_v2 = vpop.eup %777  ;;  %v404_v3 = vmul.f32 %v776_v62, %v1132_v59  ;;  %779 = vrsqrt.f32 %v1140_v0  ;;  %vm446_vm13 = vcmp.eq.f32.partialorder %v1140_v0, inf  ;;  %vm448_vm14 = vcmp.eq.f32.partialorder %v1140_v0, 0.0 }
 0x159   : > { %v1146_v4 = vpop.xlane.xlu0 %359  ;;  %v429_v5 = vmul.f32 %v774_v61, %v428_v63  ;;  %v380_v6 = vmul.f32 %v778_v2, %v1135_v60  ;;  %781 = vrsqrt.f32 %v1142_v1  ;;  %vm422_vm9 = vcmp.eq.f32.partialorder %v1142_v1, inf  ;;  %v477_v63 = vld [vmem:[%s1101_s24 + $0x10] sm:$0xff] }
 0x15a   : > { %v405_v7 = vmul.f32 %v776_v62, %v404_v3  ;;  %783 = vrsqrt.f32 %v1146_v4  ;;  %vm424_vm10 = vcmp.eq.f32.partialorder %v1142_v1, 0.0  ;;  %v425_v54 = vand.u32 2147483648, %v1142_v1  ;;  %v476_v3 = vld [vmem:[%s1101_s24 + $0x8] sm:$0xff] }
 0x15b   : > { %v381_v8 = vmul.f32 %v778_v2, %v380_v6  ;;  %v430_v9 = vmul.f32 0.5, %v429_v5  ;;  %vm398_vm11 = vcmp.eq.f32.partialorder %v1146_v4, inf  ;;  %vm400_vm12 = vcmp.eq.f32.partialorder %v1146_v4, 0.0 }
 0x15c   : > { %v406_v10 = vmul.f32 0.5, %v405_v7 }
 0x15d   : > { %v382_v11 = vmul.f32 0.5, %v381_v8  ;;  %v431_v19 = vsub.f32 1.5, %v430_v9 }
 0x15e   : > { %v780_v12 = vpop.eup %779  ;;  %v407_v13 = vsub.f32 1.5, %v406_v10 }
 0x15f   : > { %v782_v14 = vpop.eup %781  ;;  %v383_v15 = vsub.f32 1.5, %v382_v11  ;;  %v440_v16 = vmul.f32 %v780_v12, %v1140_v0  ;;  %v432_v32 = vmul.f32 %v774_v61, %v431_v19  ;;  %v478_v11 = vld [vmem:[%s1101_s24 + $0x18] sm:$0xff] }
 0x160   : > { %v1152_v17 = vpop.xlane.xlu1 %377  ;;  %v784_v18 = vpop.eup %783  ;;  %v408_v20 = vmul.f32 %v776_v62, %v407_v13  ;;  %v416_v21 = vmul.f32 %v782_v14, %v1142_v1 }
 0x161   : > { %785 = vrsqrt.f32 %v1152_v17  ;;  %v1156_v22 = vpop.xlane.xlu0 %374  ;;  %v384_v23 = vmul.f32 %v778_v2, %v383_v15  ;;  %v441_v24 = vmul.f32 %v780_v12, %v440_v16  ;;  %v392_v25 = vmul.f32 %v784_v18, %v1146_v4 }
 0x162   : > { %v417_v27 = vmul.f32 %v782_v14, %v416_v21  ;;  %787 = vrsqrt.f32 %v1156_v22  ;;  %v409_v28 = vmul.f32 %v408_v20, %v1132_v59  ;;  %v433_v46 = vmul.f32 %v432_v32, %v1130_v58  ;;  %v481_v32 = vld [vmem:[%s1101_s24 + $0x30] sm:$0xff] }
 0x163   : > { %v385_v29 = vmul.f32 %v384_v23, %v1135_v60  ;;  %v442_v30 = vmul.f32 0.5, %v441_v24  ;;  %v393_v31 = vmul.f32 %v784_v18, %v392_v25  ;;  %v401_v2 = vand.u32 2147483648, %v1146_v4 }
 0x164   : > { %v418_v33 = vmul.f32 0.5, %v417_v27  ;;  %v411_v41 = vsel %vm410_vm3, %v1132_v59, %v409_v28  ;;  %v435_v8 = vsel %vm434_vm2, %v1130_v58, %v433_v46  ;;  %vm458_vm15 = vcmp.eq.f32.partialorder %v1156_v22, inf  ;;  %v480_v58 = vld [vmem:[%s1101_s24 + $0x28] sm:$0xff] }
 0x165   : > { %v443_v35 = vsub.f32 1.5, %v442_v30  ;;  %v394_v36 = vmul.f32 0.5, %v393_v31  ;;  %v387_v38 = vsel %vm386_vm5, %v1135_v60, %v385_v29  ;;  %v414_v55 = vsel %vm412_vm4, %v413_v34, %v411_v41 }
 0x166   : > { %v419_v40 = vsub.f32 1.5, %v418_v33  ;;  %v390_v51 = vsel %vm388_vm7, %v389_v39, %v387_v38  ;;  %v438_v16 = vsel %vm436_vm8, %v437_v26, %v435_v8  ;;  %vm470_vm0 = vcmp.eq.f32.partialorder %v1152_v17, inf  ;;  %v482_v39 = vld [vmem:[%s1101_s24 + $0x38] sm:$0xff] }
 0x167   : > { %v786_v37 = vpop.eup %785  ;;  %v444_v42 = vmul.f32 %v780_v12, %v443_v35  ;;  %v395_v43 = vsub.f32 1.5, %v394_v36  ;;  %v483_v5 = vmul.f32 %v475_v52, %v390_v51  ;;  %v485_v12 = vmul.f32 %v477_v63, %v414_v55 }
 0x168   : > { %v464_v44 = vmul.f32 %v786_v37, %v1152_v17  ;;  %v788_v45 = vpop.eup %787  ;;  %v420_v47 = vmul.f32 %v782_v14, %v419_v40  ;;  %v461_v30 = vand.u32 2147483648, %v1156_v22  ;;  %vm460_vm1 = vcmp.eq.f32.partialorder %v1156_v22, 0.0 }
 0x169   : > { %v396_v48 = vmul.f32 %v784_v18, %v395_v43  ;;  %v452_v50 = vmul.f32 %v788_v45, %v1156_v22  ;;  %v445_v56 = vmul.f32 %v444_v42, %v1140_v0  ;;  %v479_v18 = vld [vmem:[%s1101_s24 + $0x20] sm:$0xff]  ;;  %v492_v19 = vsel %vm491_vm6, %v483_v5, 0.0 }
 0x16a   : > { %v465_v49 = vmul.f32 %v786_v37, %v464_v44  ;;  %v421_v53 = vmul.f32 %v420_v47, %v1142_v1  ;;  %v487_v28 = vmul.f32 %v479_v18, %v438_v16  ;;  %v495_v29 = vsel %vm491_vm6, %v485_v12, 0.0 }
 0x16b   : > { %v397_v57 = vmul.f32 %v396_v48, %v1146_v4  ;;  %v453_v62 = vmul.f32 %v788_v45, %v452_v50  ;;  %v473_v31 = vand.u32 2147483648, %v1152_v17  ;;  %vm472_vm2 = vcmp.eq.f32.partialorder %v1152_v17, 0.0 }
 0x16c   : > { %v466_v61 = vmul.f32 0.5, %v465_v49  ;;  %v423_v60 = vsel %vm422_vm9, %v1142_v1, %v421_v53  ;;  %v449_v1 = vand.u32 2147483648, %v1140_v0  ;;  %v499_v42 = vsel %vm491_vm6, %v487_v28, 0.0 }
 0x16d   : > { %v399_v59 = vsel %vm398_vm11, %v1146_v4, %v397_v57  ;;  %v454_v7 = vmul.f32 0.5, %v453_v62  ;;  %v426_v10 = vsel %vm424_vm10, %v425_v54, %v423_v60  ;;  %v447_v4 = vsel %vm446_vm13, %v1140_v0, %v445_v56 }
 0x16e   : > { %v467_v6 = vsub.f32 1.5, %v466_v61  ;;  %v402_v9 = vsel %vm400_vm12, %v401_v2, %v399_v59  ;;  %v486_v23 = vmul.f32 %v478_v11, %v426_v10  ;;  %v450_v25 = vsel %vm448_vm14, %v449_v1, %v447_v4 }
 0x16f   : > { %v455_v14 = vsub.f32 1.5, %v454_v7  ;;  %v484_v15 = vmul.f32 %v476_v3, %v402_v9  ;;  %v488_v35 = vmul.f32 %v480_v58, %v450_v25 }
 0x170   : > { %v468_v13 = vmul.f32 %v786_v37, %v467_v6  ;;  %v497_v36 = vsel %vm491_vm6, %v486_v23, 0.0 }
 0x171   : > { %v456_v21 = vmul.f32 %v788_v45, %v455_v14  ;;  %v493_v24 = vsel %vm491_vm6, %v484_v15, 0.0  ;;  %v501_v45 = vsel %vm491_vm6, %v488_v35, 0.0 }
 0x172   : > { %v469_v20 = vmul.f32 %v468_v13, %v1152_v17  ;;  %v494_v26 = vadd.f32 %v493_v24, %v492_v19 }
 0x173   : > { %v457_v0 = vmul.f32 %v456_v21, %v1156_v22 }
 0x174   : > { %v471_v27 = vsel %vm470_vm0, %v1152_v17, %v469_v20  ;;  %v496_v33 = vadd.f32 %v495_v29, %v494_v26 }
 0x175   : > { %v459_v34 = vsel %vm458_vm15, %v1156_v22, %v457_v0  ;;  %v474_v38 = vsel %vm472_vm2, %v473_v31, %v471_v27 }
 0x176   : > { %v462_v37 = vsel %vm460_vm1, %v461_v30, %v459_v34  ;;  %v498_v40 = vadd.f32 %v497_v36, %v496_v33  ;;  %v490_v44 = vmul.f32 %v482_v39, %v474_v38 }
 0x177   : > { %v489_v41 = vmul.f32 %v481_v32, %v462_v37 }
 0x178   : > { %v500_v43 = vadd.f32 %v499_v42, %v498_v40  ;;  %v505_v17 = vsel %vm491_vm6, %v490_v44, 0.0 }
 0x179   : > { %v503_v22 = vsel %vm491_vm6, %v489_v41, 0.0 }
 0x17a   : > { %v502_v46 = vadd.f32 %v501_v45, %v500_v43 }
 0x17c   : > { %v504_v47 = vadd.f32 %v503_v22, %v502_v46 }
 0x17e   : > { %v506_v48 = vadd.f32 %v505_v17, %v504_v47 }
 0x180   : > { %507 = vadd.xlane.f32.xlu2 %v506_v48 }
 0x1f3   : > { %v508_v49 = vpop.xlane.xlu2 %507 }
 0x1f4   : > { %v509_v50 = vrot.slane %v508_v49, 4 }
 0x1f6   : > { %v510_v51 = vadd.f32 %v509_v50, %v508_v49 }
 0x1f8   : > { %v511_v52 = vrot.slane %v510_v51, 2 }
 0x1fa   : > { %v512_v53 = vadd.f32 %v511_v52, %v510_v51 }
 0x1fc   : > { %v513_v54 = vrot.slane %v512_v53, 1 }
 0x1fe   : > { %v514_v55 = vadd.f32 %v513_v54, %v512_v53 }
 0x200   : > { %665 = vpush %v514_v55 }
 0x231   : > { %s666_s18 = spop %665 }
 0x232   : > { %v516_v56 = vstv %s666_s18 }
 0x233   : > { %517 = vst [vmem:[%s235_s15] sm:$0xff] %v516_v56 }
 0x234 PF: > { %s529_s28 = scalar_lea.hbm %s1292_s3, %s1090_s25  ;;  %s531_s5 = sshll.u32 %s235_s15, 4  ;;  %s532_s5 = int_to_ptr.vmem [resolvable:$true] %s531_s5 }
 0x235   : > { %s533_s26 = sshll.u32 %s529_s28, 4  ;;  %s519_s29 = scalar_lea.sflag [#allocation5], %s233_s14  ;;  %s534_s26 = int_to_ptr.hbm [resolvable:$true] %s533_s26 }
 0x236   : > { %s833_s4 = sshra.s32 %s534_s26, 4  ;;  %s839_s6 = scalar_lea.hbm %s1292_s3, 56  ;;  %s834_s4 = int_to_ptr.hbm [resolvable:$true] %s833_s4 }
 0x237   : > { %s835_s8 = scalar_lea.hbm %s834_s4, 8  ;;  %p840_p1 = scmp.lt.s32.totalorder %s834_s4, %s1292_s3 }
 0x238   : > { %p836_p11 = scmp.ne.s32.totalorder %s834_s4, %s835_s8  ;;  %p841_p4 = scmp.lt.s32.totalorder %s839_s6, %s835_s8 }
 0x23a   : > { %p837_p13 = pnand %p836_p11, %p1049_p12  ;;  %p842_p5 = por %p841_p4, %p840_p1 }
 0x23c   : > { %p838_p0 = pneg %p837_p13 }
 0x23e   : > { %p843_p6 = pnand %p842_p5, %p838_p0 }
 0x240   : > { %846 = shalt.err (!%p843_p6)
}
 0x241   : > { %669 = dma.vmem_to_hbm [thread:$0]  (%p1049_p12), %s532_s5, 128, %s534_s26, %s519_s29  }
 0x242 PF: > { %p680_p8 = scmp.ge.s32.totalorder %s941_s22, 2  ;;  %s545_s14 = sand.u32 1, %s901_s12  }
 0x243   : > { %s546_s17 = scalar_lea.sflag [#allocation5], %s545_s14 }
 0x244   : > { %p676_p3 = pnand %p680_p8, %p1062_p2 }
 0x246   : > { %p677_p9 = pneg %p676_p3 }
 0x248   : > { %896 = dma.done.wait (%p677_p9), %s546_s17, 128  }
 0x249   : > { %898 = vsyncadd (%p677_p9), %s546_s17, 4294967168  ;;  %s19_s22 = sadd.s32 1, %s941_s22   ;;  %s1307_s27 = sld [smem:[#allocation9_spill]] }
 0x24a   : > { %p16_p7 = scmp.ge.s32.totalorder %s19_s22, 30   ;;  %s1308_s14 = sld [smem:[#allocation13_spill]] }
 0x24b   : > { %s1309_s7 = sld [smem:[#allocation10_spill]]  ;;  %s1313_s12 = smov %s905_s13 }
 0x24c   : > { %s1310_s17 = sld [smem:[#allocation14_spill]]  ;;  %s1315_s15 = smov %s917_s16 }
 0x24d   : > { %s1311_s24 = sld [smem:[#allocation11_spill]]  ;;  %s1317_s18 = smov %s933_s20 }
 0x24e   : > { %s1312_s23 = sld [smem:[#allocation12_spill]]  ;;  %s1318_s19 = smov %s937_s21 }
 0x24f   : > { %s1314_s13 = smov %s1307_s27 }
 0x250   :  { %18 = sbr.rel (!%p16_p7) target bundleno = 9 (0x9), region = 91 }
 0x251   : > { %s1316_s16 = smov %s1309_s7 }
 0x253   : > { %s1319_s20 = smov %s1311_s24 }
 0x254   : > { %s1320_s21 = smov %s1312_s23 }
 0x255   :  { %552 = vsyncpa [#allocation4], 1 }
 0x256   :  { %554 = vsyncpa [#allocation4 + $0x1], 1 }
 0x257   :  { %555 = vsyncpa [#allocation5], 1 }
 0x258   :  { %557 = vsyncpa [#allocation5 + $0x1], 1 }

</bundles_post_ra>
